<compile_context>
chip_gen: v7x
topology: tpu7x:2x2x1
jax: 0.10.0
libtpu: 0.0.40
codegen_flags: <defaults>
</compile_context>

<pallas_src>
import functools

import jax
import jax.numpy as jnp
from jax.experimental import pallas as pl
from jax.experimental.pallas import tpu as pltpu


def _ctx_scatter_kernel(ctx_ref, emb_hbm_ref, out_hbm_ref, bcast_ref, sem,
                        *, c_blk, n_ctx):
    # ctx_ref:     (n_ctx, D)        VMEM  shared learnable context (already output dtype)
    # emb_hbm_ref: (n_cls, n_tkn, D) HBM   aliased with out_hbm_ref; never read
    # out_hbm_ref: (n_cls, n_tkn, D) HBM   prompts (prefix/suffix rows already in place)
    # bcast_ref:   (c_blk, n_ctx, D) VMEM  scratch holding ctx broadcast over the class block
    del emb_hbm_ref
    i = pl.program_id(0)
    # Broadcast the shared ctx across this block of classes. Cheap VPU/vst fill;
    # redone every step so the kernel stays correct when the grid is split across
    # TensorCores ("parallel" megacore semantics).
    bcast_ref[...] = jnp.broadcast_to(ctx_ref[...][None, :, :], bcast_ref.shape)
    # Write only token rows [1, 1+n_ctx) of each class straight to HBM.  Prefix
    # (row 0) and suffix rows are never touched thanks to the input/output alias.
    dst = out_hbm_ref.at[pl.ds(i * c_blk, c_blk), pl.ds(1, n_ctx), :]
    cp = pltpu.make_async_copy(bcast_ref, dst, sem)
    cp.start()
    cp.wait()


def _pick_class_block(n_cls, n_ctx, d, itemsize, vmem_budget_bytes=4 << 20):
    """Largest divisor of n_cls that keeps the broadcast scratch a few MiB and
    leaves >=2 grid steps (so both v7x TensorCores get work)."""
    per_class = max(1, n_ctx * d * itemsize)
    target = min(n_cls, 128, max(1, vmem_budget_bytes // per_class))
    if n_cls >= 2:
        target = min(target, max(1, n_cls // 2))
    c = max(1, int(target))
    while n_cls % c:
        c -= 1
    return c


def vl_prompt_learner_write_ctx(ctx, embedding):
    """prompts = embedding with token rows [1, 1+n_ctx) of every class replaced by ctx.

    `embedding` is the CLIP token embedding of the tokenized prompts, i.e. the buffer
    whose slices the PyTorch module registers as token_prefix / token_suffix.
    """
    n_ctx, d = ctx.shape
    n_cls, n_tkn, d_emb = embedding.shape
    assert d_emb == d and n_tkn >= 1 + n_ctx
    dtype = embedding.dtype
    ctx = ctx.astype(dtype)                                   # hoisted cast (once, outside grid)
    itemsize = jnp.dtype(dtype).itemsize
    c_blk = _pick_class_block(n_cls, n_ctx, d, itemsize)
    kernel = functools.partial(_ctx_scatter_kernel, c_blk=c_blk, n_ctx=n_ctx)

    return pl.pallas_call(
        kernel,
        out_shape=jax.ShapeDtypeStruct((n_cls, n_tkn, d), dtype),
        grid=(n_cls // c_blk,),
        in_specs=[
            pl.BlockSpec((n_ctx, d), lambda i: (0, 0)),       # shared ctx -> VMEM (full block)
            pl.BlockSpec(memory_space=pl.ANY),                # embedding stays in HBM (aliased)
        ],
        out_specs=pl.BlockSpec(memory_space=pl.ANY),          # prompts stay in HBM; manual DMA
        scratch_shapes=[
            pltpu.VMEM((c_blk, n_ctx, d), dtype),
            pltpu.SemaphoreType.DMA,
        ],
        input_output_aliases={1: 0},                          # prompts alias embedding buffer
        compiler_params=pltpu.CompilerParams(
            dimension_semantics=("parallel",)),
    )(ctx, embedding)


def vl_prompt_learner_forward(ctx, token_prefix, token_suffix):
    """Module-signature wrapper: cat([prefix, ctx (broadcast), suffix], dim=1).

    When the caller still holds the full token embedding (as VLPromptLearner does),
    call vl_prompt_learner_write_ctx(ctx, embedding) directly and skip this rebuild.
    """
    n_ctx, d = ctx.shape
    n_cls = token_prefix.shape[0]
    dtype = token_prefix.dtype
    filler = jnp.zeros((n_cls, n_ctx, d), dtype)              # ctx slots, overwritten in-kernel
    base = jnp.concatenate([token_prefix, filler, token_suffix], axis=1)
    return vl_prompt_learner_write_ctx(ctx, base)


if __name__ == "__main__":
    # Small synthetic configuration consistent with the module:
    n_cls, n_ctx, n_tkn, ctx_dim = 8, 4, 16, 128

    key = jax.random.PRNGKey(0)
    k_ctx, k_emb = jax.random.split(key)

    # nn.init.normal_(ctx_vectors, std=0.02)
    ctx = (0.02 * jax.random.normal(k_ctx, (n_ctx, ctx_dim))).astype(jnp.float32)
    # embedding = clip_model.token_embedding(tokenized_prompts): (n_cls, n_tkn, D)
    embedding = jax.random.normal(k_emb, (n_cls, n_tkn, ctx_dim), dtype=jnp.float32)
    token_prefix = embedding[:, :1, :]              # SOS
    token_suffix = embedding[:, 1 + n_ctx:, :]      # class tokens + EOS

    # Optimized path: aliased ctx scatter into the embedding buffer.
    prompts = jax.block_until_ready(vl_prompt_learner_write_ctx(ctx, embedding))

    # Reference semantics of VLPromptLearner.forward().
    ctx_b = jnp.broadcast_to(ctx[None, :, :], (n_cls, n_ctx, ctx_dim))
    ref = jnp.concatenate([token_prefix, ctx_b, token_suffix], axis=1)
    assert prompts.shape == (n_cls, n_tkn, ctx_dim)
    assert jnp.allclose(prompts, ref), "mismatch vs reference (embedding path)"

    # Module-signature wrapper (prefix/suffix inputs), same kernel underneath.
    prompts2 = jax.block_until_ready(
        vl_prompt_learner_forward(ctx, token_prefix, token_suffix))
    assert jnp.allclose(prompts2, ref), "mismatch vs reference (prefix/suffix path)"

    print("KERNEL_OK")
</pallas_src>

<mosaic_0001>
module attributes {stable_mosaic.version = 11 : i64} {
  func.func @_ctx_scatter_kernel(%arg0: i32, %arg1: memref<4x128xf32, #tpu.memory_space<vmem>>, %arg2: memref<8x16x128xf32, #tpu.memory_space<any>>, %arg3: memref<8x16x128xf32, #tpu.memory_space<any>>, %arg4: memref<4x4x128xf32, #tpu.memory_space<vmem>>, %arg5: memref<!tpu.dma_semaphore, #tpu.memory_space<semaphore_mem>>) attributes {dimension_semantics = [#tpu.dimension_semantics<parallel>], iteration_bounds = array<i64: 2>, scalar_prefetch = 0 : i64, scratch_operands = 2 : i64, tpu.core_type = #tpu.core_type<tc>, window_params = [{pipeline_mode = #tpu.pipeline_mode<synchronous>, transform_indices = @transform_0, window_bounds = array<i64: 4, 128>}, {}, {}]} {
    %c0 = arith.constant 0 : index
    %c0_0 = arith.constant 0 : index
    %0 = vector.load %arg1[%c0, %c0_0] : memref<4x128xf32, #tpu.memory_space<vmem>>, vector<4x128xf32>
    %1 = vector.shape_cast %0 : vector<4x128xf32> to vector<1x4x128xf32>
    %2 = vector.shape_cast %1 : vector<1x4x128xf32> to vector<1x4x128xf32>
    %3 = vector.broadcast %2 : vector<1x4x128xf32> to vector<4x4x128xf32>
    %c0_1 = arith.constant 0 : index
    %c0_2 = arith.constant 0 : index
    %c0_3 = arith.constant 0 : index
    %4 = vector.load %arg4[%c0_1, %c0_2, %c0_3] : memref<4x4x128xf32, #tpu.memory_space<vmem>>, vector<4x4x128xf32>
    tpu.vector_store %arg4[%c0_1, %c0_2, %c0_3], %3 {strides = array<i32>} : memref<4x4x128xf32, #tpu.memory_space<vmem>>, vector<4x4x128xf32>,
    %c4_i32 = arith.constant 4 : i32
    %5 = arith.muli %arg0, %c4_i32 : i32
    %c1_i32 = arith.constant 1 : i32
    %c0_i32 = arith.constant 0 : i32
    %6 = tpu.memref_slice %arg3[%5, %c1_i32, %c0_i32] : memref<8x16x128xf32, #tpu.memory_space<any>> -> memref<4x4x128xf32, #tpu.memory_space<any>>
    tpu.enqueue_dma source(%arg4 : memref<4x4x128xf32, #tpu.memory_space<vmem>>) target(%6 : memref<4x4x128xf32, #tpu.memory_space<any>>) target_semaphore(%arg5 : memref<!tpu.dma_semaphore, #tpu.memory_space<semaphore_mem>>)
    %c1_i32_4 = arith.constant 1 : i32
    %c0_i32_5 = arith.constant 0 : i32
    %7 = tpu.memref_slice %arg3[%5, %c1_i32_4, %c0_i32_5] : memref<8x16x128xf32, #tpu.memory_space<any>> -> memref<4x4x128xf32, #tpu.memory_space<any>>
    tpu.wait_dma2 semaphore(%arg5 : memref<!tpu.dma_semaphore, #tpu.memory_space<semaphore_mem>>) src(%arg4 : memref<4x4x128xf32, #tpu.memory_space<vmem>>) dst(%7 : memref<4x4x128xf32, #tpu.memory_space<any>>)
    return
  }
  func.func @transform_0(%arg0: i32) -> (i32, i32) {
    %c0_i32 = arith.constant 0 : i32
    %c0_i32_0 = arith.constant 0 : i32
    %c0_i32_1 = arith.constant 0 : i32
    return %c0_i32, %c0_i32_0 : i32, i32
  }
}

</mosaic_0001>

<bundles_post_ra>
// kernel: tpu_custom_call.1
= control target key start
LH: loop header
LB: loop body
LE: loop exit
PB: predicated region body
PF: predicated region fallthrough
CT: control target
= control target key end

     0   :  { %s157_s9 = smov 0   ;;  %s179_s0 = inlined_call_operand.vmem [shape: f32[4,128], index: 0, kind: input, shape index: {}]   ;;  %s180_s1 = inlined_call_operand.hbm [shape: f32[8,16,128], index: 1, kind: input, shape index: {}, may-alias: {1,2}]   ;;  %s181_s2 = inlined_call_operand.hbm [shape: f32[8,16,128], index: 2, kind: output, shape index: {}, may-alias: {1,2}]  }
   0x1 LB: > { %s82_s10 = sadd.s32 4294967295, %s136_s9   ;;  %p86_p0 = scmp.lt.s32.totalorder %s136_s9, 1  ;;  %s136_s9 = sphi %s157_s9, %s12_s9  }
   0x2   : > { %v48_v0 = vld [vmem:[%s179_s0] sm:$0xf] (!%p86_p0)  ;;  %s90_s1 = sshll.u32 (!%p86_p0), %s82_s10, 10  ;;  %s138_s16 = smov (!%p86_p0), [#allocation2]  }
   0x3   : > { %44 = sbr.rel (%p86_p0) target bundleno = 29 (0x1d), region = 24  ;;  %49 = vst [vmem:[#allocation2] sm:$0xf] (!%p86_p0), %v48_v0  ;;  %50 = vst [vmem:[#allocation2 + $0x4] sm:$0xf] (!%p86_p0), %v48_v0  ;;  %s75_s15 = scalar_lea.hbm (!%p86_p0), %s181_s2, %s90_s1 }
   0x4   : > { %51 = vst [vmem:[#allocation2 + $0x8] sm:$0xf] (!%p86_p0), %v48_v0  ;;  %52 = vst [vmem:[#allocation2 + $0xc] sm:$0xf] (!%p86_p0), %v48_v0  ;;  %s59_s17 = sshll.u32 (!%p86_p0), %s138_s16, 4  ;;  %s76_s18 = scalar_lea.hbm (!%p86_p0), %s75_s15, 16  ;;  %s60_s17 = int_to_ptr.vmem [resolvable:$true] %s59_s17 }
   0x5   : > { %s103_s19 = scalar_lea.vmem (!%p86_p0), %s60_s17, 256  ;;  %p108_p2 = scmp.lt.s32.totalorder (!%p86_p0), %s60_s17, %s60_s17 }
   0x6   : > { %p104_p1 = scmp.ne.s32.totalorder (!%p86_p0), %s60_s17, %s103_s19  ;;  %p109_p3 = scmp.lt.s32.totalorder (!%p86_p0), %s103_s19, %s103_s19 }
   0x8   : > { %p110_p4 = por (!%p86_p0), %p109_p3, %p108_p2 }
   0xa   : > { %p111_p5 = pnand %p110_p4, %p104_p1 }
   0xc   : > { %114 = shalt.err (!%p111_p5)  }
   0xd   : > { %s127_s20 = scalar_lea.hbm %s75_s15, 272  ;;  %s117_s23 = scalar_lea.hbm %s181_s2, 2048 }
   0xe   : > { %p116_p6 = scmp.ne.s32.totalorder %s76_s18, %s127_s20  ;;  %p118_p7 = scmp.lt.u32.totalorder %s76_s18, %s181_s2 }
   0xf   : > { %p119_p8 = scmp.lt.u32.totalorder %s117_s23, %s127_s20  ;;  %p121_p10 = scmp.lt.u32.totalorder %s127_s20, %s76_s18 }
  0x11   : > { %p120_p9 = por %p119_p8, %p118_p7 }
  0x13   : > { %p122_p11 = por %p121_p10, %p120_p9 }
  0x15   : > { %p123_p12 = pnand %p122_p11, %p116_p6 }
  0x17   : > { %126 = shalt.err (!%p123_p12)  }
  0x18   : > { %s139_s26 = smov 64   ;;  %s140_s27 = smov 256  }
  0x19   : > { %s141_s28 = smov 4  }
  0x1a   : > { %62 = dma.vmem_to_hbm [thread:$0]  %s60_s17, 256, %s76_s18, [#allocation3], %s139_s26, %s140_s27, %s141_s28 }
  0x1b   : > { %132 = dma.done.wait [#allocation3], 256 }
  0x1c   : > { %133 = vsyncadd [#allocation3], 4294967040 }
  0x1d PF: > { %s12_s9 = sadd.s32 1, %s136_s9  }
  0x1e   : > { %p9_p13 = scmp.ge.s32.totalorder %s12_s9, 3  }
  0x20   :  { %11 = sbr.rel (!%p9_p13) target bundleno = 1 (0x1), region = 36 }
  0x27   :  { %67 = vsyncmov [#allocation3] }
  0x2a   :  { %s68_s29 = vpop.sfrf %67 }
  0x2b   :  { %p89_p0 = scmp.ne.s32.totalorder %s68_s29, 0 }
  0x2d   :  { %72 = shalt.err (%p89_p0)  }

</bundles_post_ra>
